<compile_context>
chip_gen: v7x
topology: tpu7x:2x2x1
jax: 0.10.0
libtpu: 0.0.40
codegen_flags: <defaults>
</compile_context>

<pallas_src>
import functools

import jax
import jax.numpy as jnp
from jax.experimental import pallas as pl
from jax.experimental.pallas import tpu as pltpu


def _round_up(x, m):
    return ((x + m - 1) // m) * m


def _cross_modal_kernel(v_ref, w1_ref, b1_ref, w2_ref, b2_ref, out_ref, *,
                        scale_after_proj):
    f32 = jnp.float32
    # fused: visual_to_text_dim -> attn value in-proj -> attn out-proj -> residual
    x = jnp.dot(v_ref[...], w1_ref[...], preferred_element_type=f32) + b1_ref[...]

    # LayerNorm(text_dim), eps=1e-5, always in f32.
    # One-pass stats: var = E[x^2] - mean^2 (two back-to-back XLU reductions).
    # NOTE: all ops are per-row -> stale rows in a partial edge block are safe
    # (they are masked on the output store).
    mean = jnp.mean(x, axis=-1, keepdims=True)
    mean_sq = jnp.mean(x * x, axis=-1, keepdims=True)
    inv = jax.lax.rsqrt(jnp.maximum(mean_sq - mean * mean, 0.0) + 1e-5)
    xc = x - mean

    if scale_after_proj:
        # per-row scalar rsqrt commutes with the matmul -> apply on the narrower side
        y = jnp.dot(xc.astype(w2_ref.dtype), w2_ref[...], preferred_element_type=f32)
        out_ref[...] = (y * inv + b2_ref[...]).astype(out_ref.dtype)
    else:
        xn = (xc * inv).astype(w2_ref.dtype)
        y = jnp.dot(xn, w2_ref[...], preferred_element_type=f32)
        out_ref[...] = (y + b2_ref[...]).astype(out_ref.dtype)


def cross_modal_attention_t(query, key, value, params, *, num_heads,
                            compute_dtype=jnp.bfloat16, block_rows=None,
                            single_buffer_weights=True):
    """Matches CrossModalAttentionT.forward (eval mode). Returns (1, B, va_dim).

    `query`/`key` are accepted for interface parity: with seq_len == 1 the
    attention weights are exactly 1 (softmax over a single key), so they cannot
    affect the output. Exact only for attention dropout == 0 (inference).
    """
    del query, key, num_heads  # dead path with seq_len == 1

    B, va_dim = value.shape
    text_dim = params["wvt"].shape[0]
    f32 = jnp.float32

    wvt = params["wvt"].astype(f32)
    bvt = params["bvt"].astype(f32).reshape(1, text_dim)
    wv, bv = params["wv"].astype(f32), params["bv"].astype(f32).reshape(1, text_dim)
    wo, bo = params["wo"].astype(f32), params["bo"].astype(f32).reshape(1, text_dim)
    gamma = params["gamma"].astype(f32).reshape(1, text_dim)
    beta = params["beta"].astype(f32).reshape(1, text_dim)
    wop, bop = params["wop"].astype(f32), params["bop"].astype(f32).reshape(1, va_dim)

    # ---- fold + pre-transpose all weights in f32 in the wrapper ----
    eye = jnp.eye(text_dim, dtype=f32)
    w_res = eye + wo @ wv                    # residual + (out-proj @ value in-proj)
    w1 = (w_res @ wvt).T                     # (va_dim, text_dim), pre-transposed
    b1 = bvt @ w_res.T + bv @ wo.T + bo      # (1, text_dim)
    w2 = gamma.T * wop.T                     # (text_dim, va_dim) = diag(gamma) @ Wop^T
    b2 = beta @ wop.T + bop                  # (1, va_dim)

    out_dim = va_dim
    cd_size = jnp.dtype(compute_dtype).itemsize

    # ---- batch tile: per-row byte budget, keep both v7x TCs busy ----
    row_bytes = (2 * va_dim * cd_size        # value tile, double-buffered
                 + 2 * out_dim * 4           # f32 output tile, double-buffered
                 + 3 * text_dim * 4)         # LayerNorm intermediates (estimate)
    min_tile = 16                            # covers f32 and bf16 sublane tiling
    if block_rows is None:
        tm = max(min_tile, ((4 << 20) // row_bytes) // 128 * 128)
    else:
        tm = max(min_tile, block_rows)
    # cap so a v7x megacore sees >= 2 parallel grid steps whenever B allows it
    tm = min(tm, max(min_tile, _round_up(pl.cdiv(B, 2), 128)))
    if tm >= B:
        tm = B                               # single full-array block (always legal)
    grid = (pl.cdiv(B, tm),)                 # partial edge block masked on store

    wbuf = 1 if single_buffer_weights else 2
    weight_bytes = wbuf * (va_dim * text_dim * cd_size + text_dim * 4
                           + text_dim * out_dim * cd_size + out_dim * 4)
    vmem_needed = tm * row_bytes + weight_bytes
    vmem_limit = int(min(64 << 20, max(32 << 20, 2 * vmem_needed)))

    val = value if value.dtype == compute_dtype else value.astype(compute_dtype)
    w1c, w2c = w1.astype(compute_dtype), w2.astype(compute_dtype)
    kernel = functools.partial(_cross_modal_kernel,
                               scale_after_proj=(out_dim <= text_dim))

    def _run(single_buffer):
        # constant-index weights never change block -> single buffer saves VMEM
        wk = {"pipeline_mode": pl.Buffered(1)} if single_buffer else {}
        return pl.pallas_call(
            kernel,
            out_shape=jax.ShapeDtypeStruct((B, out_dim), f32),
            grid=grid,
            in_specs=[
                pl.BlockSpec((tm, va_dim), lambda i: (i, 0)),           # activations
                pl.BlockSpec((va_dim, text_dim), lambda i: (0, 0), **wk),
                pl.BlockSpec((1, text_dim), lambda i: (0, 0), **wk),
                pl.BlockSpec((text_dim, out_dim), lambda i: (0, 0), **wk),
                pl.BlockSpec((1, out_dim), lambda i: (0, 0), **wk),
            ],
            out_specs=pl.BlockSpec((tm, out_dim), lambda i: (i, 0)),
            compiler_params=pltpu.CompilerParams(
                dimension_semantics=("parallel",),
                vmem_limit_bytes=vmem_limit),
        )(val, w1c, b1, w2c, b2)

    if single_buffer_weights:
        try:
            out = _run(True)
        except Exception:  # pl.Buffered(1) unsupported on this JAX -> default buffering
            out = _run(False)
    else:
        out = _run(False)

    return out[None]                          # (1, B, va_dim) -- matches PyTorch


def init_params(key, text_dim, va_dim):
    ks = jax.random.split(key, 12)
    s = 0.05

    def rnd(k, shape):
        return jax.random.normal(k, shape, jnp.float32) * s

    return {
        "wvt": rnd(ks[0], (text_dim, va_dim)),
        "bvt": rnd(ks[1], (1, text_dim)),
        "wq": rnd(ks[2], (text_dim, text_dim)),
        "bq": rnd(ks[3], (1, text_dim)),
        "wk": rnd(ks[4], (text_dim, text_dim)),
        "bk": rnd(ks[5], (1, text_dim)),
        "wv": rnd(ks[6], (text_dim, text_dim)),
        "bv": rnd(ks[7], (1, text_dim)),
        "wo": rnd(ks[8], (text_dim, text_dim)),
        "bo": rnd(ks[9], (1, text_dim)),
        "gamma": jnp.ones((1, text_dim), jnp.float32),
        "beta": jnp.zeros((1, text_dim), jnp.float32),
        "wop": rnd(ks[10], (va_dim, text_dim)),
        "bop": rnd(ks[11], (1, va_dim)),
    }


def reference_forward(query, key, value, params, *, num_heads):
    """Pure-JAX replica of the full PyTorch forward (for validation)."""
    key_p = key @ params["wvt"].T + params["bvt"]
    val_p = value @ params["wvt"].T + params["bvt"]
    q = query @ params["wq"].T + params["bq"]
    k = key_p @ params["wk"].T + params["bk"]
    v = val_p @ params["wv"].T + params["bv"]
    B, E = q.shape
    Dh = E // num_heads
    qh = q.reshape(B, num_heads, Dh)
    kh = k.reshape(B, num_heads, Dh)
    vh = v.reshape(B, num_heads, Dh)
    scores = jnp.sum(qh * kh, axis=-1, keepdims=True) / jnp.sqrt(Dh)  # (B,H,1), seq=1
    wts = jax.nn.softmax(scores, axis=-1)                             # exactly 1
    attn = (wts * vh).reshape(B, E)
    attn_out = attn @ params["wo"].T + params["bo"]
    x = val_p + attn_out
    mean = jnp.mean(x, axis=-1, keepdims=True)
    var = jnp.mean((x - mean) ** 2, axis=-1, keepdims=True)
    xn = (x - mean) / jnp.sqrt(var + 1e-5)
    xn = xn * params["gamma"] + params["beta"]
    return (xn @ params["wop"].T + params["bop"])[None]


if __name__ == "__main__":
    text_dim, va_dim, num_heads = 32, 16, 4
    root = jax.random.PRNGKey(0)
    kp, kq, kk, kv = jax.random.split(root, 4)
    params = init_params(kp, text_dim, va_dim)

    # --- small batch: single full block path ---
    B = 8
    query = jax.random.normal(kq, (B, text_dim), jnp.float32)   # text features
    key = jax.random.normal(kk, (B, va_dim), jnp.float32)       # visual/audio features
    value = jax.random.normal(kv, (B, va_dim), jnp.float32)     # visual/audio features
    ref = reference_forward(query, key, value, params, num_heads=num_heads)

    # default bf16 MXU-operand path (biases + LayerNorm in f32)
    out_bf16 = jax.block_until_ready(
        cross_modal_attention_t(query, key, value, params, num_heads=num_heads))
    assert out_bf16.shape == (1, B, va_dim)
    assert jnp.allclose(out_bf16, ref, atol=5e-2, rtol=5e-2), "bf16 kernel mismatch"

    # full-f32 path, tight tolerance
    out_f32 = jax.block_until_ready(
        cross_modal_attention_t(query, key, value, params, num_heads=num_heads,
                                compute_dtype=jnp.float32))
    assert jnp.allclose(out_f32, ref, atol=1e-4, rtol=1e-4), "f32 kernel mismatch"

    # --- larger batch: multi-step grid with a masked partial edge block ---
    B2 = 300
    kq2, kk2, kv2 = jax.random.split(jax.random.PRNGKey(1), 3)
    query2 = jax.random.normal(kq2, (B2, text_dim), jnp.float32)
    key2 = jax.random.normal(kk2, (B2, va_dim), jnp.float32)
    value2 = jax.random.normal(kv2, (B2, va_dim), jnp.float32)
    ref2 = reference_forward(query2, key2, value2, params, num_heads=num_heads)
    out2 = jax.block_until_ready(
        cross_modal_attention_t(query2, key2, value2, params, num_heads=num_heads))
    assert out2.shape == (1, B2, va_dim)
    assert jnp.allclose(out2, ref2, atol=5e-2, rtol=5e-2), "tiled bf16 kernel mismatch"

    print("KERNEL_OK")
</pallas_src>

<mosaic_0001>
module attributes {stable_mosaic.version = 11 : i64} {
  func.func @_cross_modal_kernel(%arg0: i32, %arg1: memref<8x16xbf16, #tpu.memory_space<vmem>>, %arg2: memref<16x32xbf16, #tpu.memory_space<vmem>>, %arg3: memref<1x32xf32, #tpu.memory_space<vmem>>, %arg4: memref<32x16xbf16, #tpu.memory_space<vmem>>, %arg5: memref<1x16xf32, #tpu.memory_space<vmem>>, %arg6: memref<8x16xf32, #tpu.memory_space<vmem>>) attributes {dimension_semantics = [#tpu.dimension_semantics<parallel>], iteration_bounds = array<i64: 1>, scalar_prefetch = 0 : i64, scratch_operands = 0 : i64, tpu.core_type = #tpu.core_type<tc>, window_params = [{transform_indices = @transform_0, window_bounds = array<i64: 8, 16>}, {pipeline_mode = #tpu.pipeline_mode<synchronous>, transform_indices = @transform_1, window_bounds = array<i64: 16, 32>}, {pipeline_mode = #tpu.pipeline_mode<synchronous>, transform_indices = @transform_2, window_bounds = array<i64: 1, 32>}, {pipeline_mode = #tpu.pipeline_mode<synchronous>, transform_indices = @transform_3, window_bounds = array<i64: 32, 16>}, {pipeline_mode = #tpu.pipeline_mode<synchronous>, transform_indices = @transform_4, window_bounds = array<i64: 1, 16>}, {transform_indices = @transform_5, window_bounds = array<i64: 8, 16>}]} {
    %c0 = arith.constant 0 : index
    %c0_0 = arith.constant 0 : index
    %0 = vector.load %arg1[%c0, %c0_0] : memref<8x16xbf16, #tpu.memory_space<vmem>>, vector<8x16xbf16>
    %c0_1 = arith.constant 0 : index
    %c0_2 = arith.constant 0 : index
    %1 = vector.load %arg2[%c0_1, %c0_2] : memref<16x32xbf16, #tpu.memory_space<vmem>>, vector<16x32xbf16>
    %cst = arith.constant dense<0.000000e+00> : vector<8x32xf32>
    %2 = tpu.matmul %0, %1, %cst {dimension_numbers = #tpu.dot_dimension_numbers<[1], [0], [0], [1], [0, 0, 1, 1], [], []>} : vector<8x16xbf16>, vector<16x32xbf16>, vector<8x32xf32> -> vector<8x32xf32>
    %c0_3 = arith.constant 0 : index
    %c0_4 = arith.constant 0 : index
    %3 = vector.load %arg3[%c0_3, %c0_4] : memref<1x32xf32, #tpu.memory_space<vmem>>, vector<1x32xf32>
    %4 = vector.broadcast %3 : vector<1x32xf32> to vector<8x32xf32>
    %5 = arith.addf %2, %4 : vector<8x32xf32>
    %cst_5 = arith.constant dense<0.000000e+00> : vector<8xf32>
    %6 = vector.multi_reduction <add>, %5, %cst_5 [1] : vector<8x32xf32> to vector<8xf32>
    %7 = vector.shape_cast %6 : vector<8xf32> to vector<8x1xf32>
    %cst_6 = arith.constant 3.200000e+01 : f32
    %8 = vector.broadcast %cst_6 : f32 to vector<8x1xf32>
    %9 = arith.divf %7, %8 : vector<8x1xf32>
    %10 = arith.mulf %5, %5 : vector<8x32xf32>
    %cst_7 = arith.constant dense<0.000000e+00> : vector<8xf32>
    %11 = vector.multi_reduction <add>, %10, %cst_7 [1] : vector<8x32xf32> to vector<8xf32>
    %12 = vector.shape_cast %11 : vector<8xf32> to vector<8x1xf32>
    %cst_8 = arith.constant 3.200000e+01 : f32
    %13 = vector.broadcast %cst_8 : f32 to vector<8x1xf32>
    %14 = arith.divf %12, %13 : vector<8x1xf32>
    %15 = arith.mulf %9, %9 : vector<8x1xf32>
    %16 = arith.subf %14, %15 : vector<8x1xf32>
    %cst_9 = arith.constant 0.000000e+00 : f32
    %17 = vector.broadcast %cst_9 : f32 to vector<8x1xf32>
    %18 = arith.maximumf %16, %17 : vector<8x1xf32>
    %cst_10 = arith.constant 9.99999974E-6 : f32
    %19 = vector.broadcast %cst_10 : f32 to vector<8x1xf32>
    %20 = arith.addf %18, %19 : vector<8x1xf32>
    %21 = math.rsqrt %20 : vector<8x1xf32>
    %22 = vector.broadcast %9 : vector<8x1xf32> to vector<8x32xf32>
    %23 = arith.subf %5, %22 : vector<8x32xf32>
    %24 = arith.truncf %23 : vector<8x32xf32> to vector<8x32xbf16>
    %c0_11 = arith.constant 0 : index
    %c0_12 = arith.constant 0 : index
    %25 = vector.load %arg4[%c0_11, %c0_12] : memref<32x16xbf16, #tpu.memory_space<vmem>>, vector<32x16xbf16>
    %cst_13 = arith.constant dense<0.000000e+00> : vector<8x16xf32>
    %26 = tpu.matmul %24, %25, %cst_13 {dimension_numbers = #tpu.dot_dimension_numbers<[1], [0], [0], [1], [0, 0, 1, 1], [], []>} : vector<8x32xbf16>, vector<32x16xbf16>, vector<8x16xf32> -> vector<8x16xf32>
    %27 = vector.broadcast %21 : vector<8x1xf32> to vector<8x16xf32>
    %28 = arith.mulf %26, %27 : vector<8x16xf32>
    %c0_14 = arith.constant 0 : index
    %c0_15 = arith.constant 0 : index
    %29 = vector.load %arg5[%c0_14, %c0_15] : memref<1x16xf32, #tpu.memory_space<vmem>>, vector<1x16xf32>
    %30 = vector.broadcast %29 : vector<1x16xf32> to vector<8x16xf32>
    %31 = arith.addf %28, %30 : vector<8x16xf32>
    %c0_16 = arith.constant 0 : index
    %c0_17 = arith.constant 0 : index
    %32 = vector.load %arg6[%c0_16, %c0_17] : memref<8x16xf32, #tpu.memory_space<vmem>>, vector<8x16xf32>
    tpu.vector_store %arg6[%c0_16, %c0_17], %31 {strides = array<i32>} : memref<8x16xf32, #tpu.memory_space<vmem>>, vector<8x16xf32>,
    return
  }
  func.func @transform_0(%arg0: i32) -> (i32, i32) {
    %c0_i32 = arith.constant 0 : i32
    %c0_i32_0 = arith.constant 0 : i32
    return %arg0, %c0_i32 : i32, i32
  }
  func.func @transform_1(%arg0: i32) -> (i32, i32) {
    %c0_i32 = arith.constant 0 : i32
    %c0_i32_0 = arith.constant 0 : i32
    %c0_i32_1 = arith.constant 0 : i32
    return %c0_i32, %c0_i32_0 : i32, i32
  }
  func.func @transform_2(%arg0: i32) -> (i32, i32) {
    %c0_i32 = arith.constant 0 : i32
    %c0_i32_0 = arith.constant 0 : i32
    %c0_i32_1 = arith.constant 0 : i32
    return %c0_i32, %c0_i32_0 : i32, i32
  }
  func.func @transform_3(%arg0: i32) -> (i32, i32) {
    %c0_i32 = arith.constant 0 : i32
    %c0_i32_0 = arith.constant 0 : i32
    %c0_i32_1 = arith.constant 0 : i32
    return %c0_i32, %c0_i32_0 : i32, i32
  }
  func.func @transform_4(%arg0: i32) -> (i32, i32) {
    %c0_i32 = arith.constant 0 : i32
    %c0_i32_0 = arith.constant 0 : i32
    %c0_i32_1 = arith.constant 0 : i32
    return %c0_i32, %c0_i32_0 : i32, i32
  }
  func.func @transform_5(%arg0: i32) -> (i32, i32) {
    %c0_i32 = arith.constant 0 : i32
    %c0_i32_0 = arith.constant 0 : i32
    return %arg0, %c0_i32 : i32, i32
  }
}

module attributes {stable_mosaic.version = 11 : i64} {
  func.func @_cross_modal_kernel(%arg0: i32, %arg1: memref<8x16xbf16, #tpu.memory_space<vmem>>, %arg2: memref<16x32xbf16, #tpu.memory_space<vmem>>, %arg3: memref<1x32xf32, #tpu.memory_space<vmem>>, %arg4: memref<32x16xbf16, #tpu.memory_space<vmem>>, %arg5: memref<1x16xf32, #tpu.memory_space<vmem>>, %arg6: memref<8x16xf32, #tpu.memory_space<vmem>>) attributes {dimension_semantics = [#tpu.dimension_semantics<parallel>], iteration_bounds = array<i64: 1>, scalar_prefetch = 0 : i64, scratch_operands = 0 : i64, tpu.core_type = #tpu.core_type<tc>, window_params = [{transform_indices = @transform_0, window_bounds = array<i64: 8, 16>}, {pipeline_mode = #tpu.pipeline_mode<synchronous>, transform_indices = @transform_1, window_bounds = array<i64: 16, 32>}, {pipeline_mode = #tpu.pipeline_mode<synchronous>, transform_indices = @transform_2, window_bounds = array<i64: 1, 32>}, {pipeline_mode = #tpu.pipeline_mode<synchronous>, transform_indices = @transform_3, window_bounds = array<i64: 32, 16>}, {pipeline_mode = #tpu.pipeline_mode<synchronous>, transform_indices = @transform_4, window_bounds = array<i64: 1, 16>}, {transform_indices = @transform_5, window_bounds = array<i64: 8, 16>}]} {
    %c0 = arith.constant 0 : index
    %c0_0 = arith.constant 0 : index
    %0 = vector.load %arg1[%c0, %c0_0] : memref<8x16xbf16, #tpu.memory_space<vmem>>, vector<8x16xbf16>
    %c0_1 = arith.constant 0 : index
    %c0_2 = arith.constant 0 : index
    %1 = vector.load %arg2[%c0_1, %c0_2] : memref<16x32xbf16, #tpu.memory_space<vmem>>, vector<16x32xbf16>
    %cst = arith.constant dense<0.000000e+00> : vector<8x32xf32>
    %2 = tpu.matmul %0, %1, %cst {dimension_numbers = #tpu.dot_dimension_numbers<[1], [0], [0], [1], [0, 0, 1, 1], [], []>} : vector<8x16xbf16>, vector<16x32xbf16>, vector<8x32xf32> -> vector<8x32xf32>
    %c0_3 = arith.constant 0 : index
    %c0_4 = arith.constant 0 : index
    %3 = vector.load %arg3[%c0_3, %c0_4] : memref<1x32xf32, #tpu.memory_space<vmem>>, vector<1x32xf32>
    %4 = vector.broadcast %3 : vector<1x32xf32> to vector<8x32xf32>
    %5 = arith.addf %2, %4 : vector<8x32xf32>
    %cst_5 = arith.constant dense<0.000000e+00> : vector<8xf32>
    %6 = vector.multi_reduction <add>, %5, %cst_5 [1] : vector<8x32xf32> to vector<8xf32>
    %7 = vector.shape_cast %6 : vector<8xf32> to vector<8x1xf32>
    %cst_6 = arith.constant 3.200000e+01 : f32
    %8 = vector.broadcast %cst_6 : f32 to vector<8x1xf32>
    %9 = arith.divf %7, %8 : vector<8x1xf32>
    %10 = arith.mulf %5, %5 : vector<8x32xf32>
    %cst_7 = arith.constant dense<0.000000e+00> : vector<8xf32>
    %11 = vector.multi_reduction <add>, %10, %cst_7 [1] : vector<8x32xf32> to vector<8xf32>
    %12 = vector.shape_cast %11 : vector<8xf32> to vector<8x1xf32>
    %cst_8 = arith.constant 3.200000e+01 : f32
    %13 = vector.broadcast %cst_8 : f32 to vector<8x1xf32>
    %14 = arith.divf %12, %13 : vector<8x1xf32>
    %15 = arith.mulf %9, %9 : vector<8x1xf32>
    %16 = arith.subf %14, %15 : vector<8x1xf32>
    %cst_9 = arith.constant 0.000000e+00 : f32
    %17 = vector.broadcast %cst_9 : f32 to vector<8x1xf32>
    %18 = arith.maximumf %16, %17 : vector<8x1xf32>
    %cst_10 = arith.constant 9.99999974E-6 : f32
    %19 = vector.broadcast %cst_10 : f32 to vector<8x1xf32>
    %20 = arith.addf %18, %19 : vector<8x1xf32>
    %21 = math.rsqrt %20 : vector<8x1xf32>
    %22 = vector.broadcast %9 : vector<8x1xf32> to vector<8x32xf32>
    %23 = arith.subf %5, %22 : vector<8x32xf32>
    %24 = arith.truncf %23 : vector<8x32xf32> to vector<8x32xbf16>
    %c0_11 = arith.constant 0 : index
    %c0_12 = arith.constant 0 : index
    %25 = vector.load %arg4[%c0_11, %c0_12] : memref<32x16xbf16, #tpu.memory_space<vmem>>, vector<32x16xbf16>
    %cst_13 = arith.constant dense<0.000000e+00> : vector<8x16xf32>
    %26 = tpu.matmul %24, %25, %cst_13 {dimension_numbers = #tpu.dot_dimension_numbers<[1], [0], [0], [1], [0, 0, 1, 1], [], []>} : vector<8x32xbf16>, vector<32x16xbf16>, vector<8x16xf32> -> vector<8x16xf32>
    %27 = vector.broadcast %21 : vector<8x1xf32> to vector<8x16xf32>
    %28 = arith.mulf %26, %27 : vector<8x16xf32>
    %c0_14 = arith.constant 0 : index
    %c0_15 = arith.constant 0 : index
    %29 = vector.load %arg5[%c0_14, %c0_15] : memref<1x16xf32, #tpu.memory_space<vmem>>, vector<1x16xf32>
    %30 = vector.broadcast %29 : vector<1x16xf32> to vector<8x16xf32>
    %31 = arith.addf %28, %30 : vector<8x16xf32>
    %c0_16 = arith.constant 0 : index
    %c0_17 = arith.constant 0 : index
    %32 = vector.load %arg6[%c0_16, %c0_17] : memref<8x16xf32, #tpu.memory_space<vmem>>, vector<8x16xf32>
    tpu.vector_store %arg6[%c0_16, %c0_17], %31 {strides = array<i32>} : memref<8x16xf32, #tpu.memory_space<vmem>>, vector<8x16xf32>,
    return
  }
  func.func @transform_0(%arg0: i32) -> (i32, i32) {
    %c0_i32 = arith.constant 0 : i32
    %c0_i32_0 = arith.constant 0 : i32
    return %arg0, %c0_i32 : i32, i32
  }
  func.func @transform_1(%arg0: i32) -> (i32, i32) {
    %c0_i32 = arith.constant 0 : i32
    %c0_i32_0 = arith.constant 0 : i32
    %c0_i32_1 = arith.constant 0 : i32
    return %c0_i32, %c0_i32_0 : i32, i32
  }
  func.func @transform_2(%arg0: i32) -> (i32, i32) {
    %c0_i32 = arith.constant 0 : i32
    %c0_i32_0 = arith.constant 0 : i32
    %c0_i32_1 = arith.constant 0 : i32
    return %c0_i32, %c0_i32_0 : i32, i32
  }
  func.func @transform_3(%arg0: i32) -> (i32, i32) {
    %c0_i32 = arith.constant 0 : i32
    %c0_i32_0 = arith.constant 0 : i32
    %c0_i32_1 = arith.constant 0 : i32
    return %c0_i32, %c0_i32_0 : i32, i32
  }
  func.func @transform_4(%arg0: i32) -> (i32, i32) {
    %c0_i32 = arith.constant 0 : i32
    %c0_i32_0 = arith.constant 0 : i32
    %c0_i32_1 = arith.constant 0 : i32
    return %c0_i32, %c0_i32_0 : i32, i32
  }
  func.func @transform_5(%arg0: i32) -> (i32, i32) {
    %c0_i32 = arith.constant 0 : i32
    %c0_i32_0 = arith.constant 0 : i32
    return %arg0, %c0_i32 : i32, i32
  }
}

</mosaic_0001>

<bundles_post_ra>
// kernel: tpu_custom_call.1
= control target key start
LH: loop header
LB: loop body
LE: loop exit
PB: predicated region body
PF: predicated region fallthrough
CT: control target
= control target key end

     0   :  { %v241_v1 = vmov 0.0   ;;  %vm38_vm0 = vcmask 130048   ;;  %vm242_vm1 = vmmov 0   ;;  %s309_s0 = inlined_call_operand.vmem [shape: bf16[8,16], index: 0, kind: input, shape index: {}]   ;;  %s310_s1 = inlined_call_operand.vmem [shape: bf16[16,32], index: 1, kind: input, shape index: {}]   ;;  %s311_s2 = inlined_call_operand.vmem [shape: f32[1,32], index: 2, kind: input, shape index: {}]   ;;  %s312_s3 = inlined_call_operand.vmem [shape: bf16[32,16], index: 3, kind: input, shape index: {}]   ;;  %s313_s4 = inlined_call_operand.vmem [shape: f32[1,16], index: 4, kind: input, shape index: {}]   ;;  %s314_s5 = inlined_call_operand.hbm [shape: f32[8,16], index: 5, kind: output, shape index: {}]  }
   0x1   :  { %v212_v0 = vld [vmem:[%s310_s1] sm:$0xff]   ;;  %195 = vmatprep.subr.bf16.mxu0 %v241_v1  ;;  %201 = vmatprep.subr.bf16.mxu1 %v241_v1 }
   0x2   :  { %v22_v2 = vld [vmem:[%s309_s0] sm:$0xf]  ;;  %196 = vmatpush3.bf16.msra.mxu0 %v212_v0  ;;  %197 = vmatprep.mubr.msk.bf16.mxu0 %vm242_vm1, %v241_v1 }
   0x3   :  { %205 = vmatprep.mubr.msk.bf16.mxu1 %vm242_vm1, %v241_v1 }
   0x4   :  { %10 = vsyncpa [#allocation3], 0  ;;  %v213_v3 = vld [vmem:[%s312_s3] sm:$0xff]   ;;  %vm82_vm2 = vcmask 261120   ;;  %v214_v13 = vld [vmem:[%s312_s3 + $0x8] sm:$0xff]   ;;  %s243_s3 = smov [#allocation2]  }
   0x5   :  { %198 = vmatmul.mubr.msk.bf16.vlgmr.msra.gmra.mrb[0].mxu0 %vm38_vm0, %v22_v2  ;;  %202 = vmatpush3.bf16.msra.mxu1 %v213_v3  ;;  %v183_v4 = vld [vmem:[%s311_s2] ss:$0 sm:$0xff]  ;;  %s175_s27 = sshll.u32 %s243_s3, 4  ;;  %s176_s27 = int_to_ptr.vmem [resolvable:$true] %s175_s27 }
   0x6   :  { %203 = vmatprep.subr.bf16.mxu1 %v241_v1  ;;  %v189_v26 = vld [vmem:[%s313_s4] ss:$0 sm:$0xff]  ;;  %s217_s28 = scalar_lea.vmem %s176_s27, 128  ;;  %p222_p1 = scmp.lt.s32.totalorder %s176_s27, %s176_s27 }
   0x7   :  { %p218_p0 = scmp.ne.s32.totalorder %s176_s27, %s217_s28  ;;  %p223_p2 = scmp.lt.s32.totalorder %s217_s28, %s217_s28 }
   0x9   :  { %204 = vmatpush3.bf16.msra.mxu1 %v214_v13  ;;  %p224_p3 = por %p223_p2, %p222_p1 }
   0xb   :  { %p225_p4 = pnand %p224_p3, %p218_p0 }
  0xd8   :  { %v76_v5 = vpop.f32.mrb[0].mxu0 }
  0xd9   :  { %v77_v6 = vadd.f32 %v183_v4, %v76_v5  ;;  %v199_v7 = vpop.f32.mrb[1].mxu0 }
  0xda   :  { %v79_v8 = vpop.f32.mrb[2].mxu0 }
  0xdb   :  { %v200_v9 = vpop.f32.mrb[3].mxu0  ;;  %v83_v10 = vsel %vm82_vm2, %v77_v6, 0.0  ;;  %v88_v11 = vmul.f32 %v77_v6, %v77_v6 }
  0xdc   :  { %84 = vadd.xlane.f32.xlu0 %v83_v10 }
  0xdd   :  { %v89_v12 = vsel %vm82_vm2, %v88_v11, 0.0 }
  0xe0   :  { %90 = vadd.xlane.f32.xlu0 %v89_v12 }
 0x169   :  { %v85_v14 = vpop.xlane.xlu0 %84 }
 0x16a   :  { %v87_v15 = vmul.f32 0.03125, %v85_v14 }
 0x16c   :  { %v98_v16 = vsub.f32 %v77_v6, %v87_v15  ;;  %v93_v20 = vmul.f32 %v87_v15, %v87_v15 }
 0x16d   :  { %v91_v18 = vpop.xlane.xlu0 %90 }
 0x16e   :  { %v99_v17 = vpack.c.bf16 %v98_v16, %v98_v16  ;;  %v92_v19 = vmul.f32 0.03125, %v91_v18 }
 0x170   :  { %206 = vmatmul.mubr.msk.bf16.vlgmr.msra.gmra.mrb[0].mxu1 %vm82_vm2, %v99_v17  ;;  %v94_v21 = vsub.f32 %v92_v19, %v93_v20 }
 0x172   :  { %v95_v22 = vmax.f32 %v94_v21, 0.0 }
 0x174   :  { %v96_v23 = vadd.f32 1e-05, %v95_v22 }
 0x176   :  { %215 = vrsqrt.f32 %v96_v23 }
 0x180   :  { %v216_v24 = vpop.eup %215 }
 0x243   :  { %v153_v25 = vpop.f32.mrb[0].mxu1 }
 0x244   :  { %v159_v27 = vmul.f32 %v216_v24, %v153_v25  ;;  %v207_v28 = vpop.f32.mrb[1].mxu1 }
 0x245   :  { %v156_v29 = vpop.f32.mrb[2].mxu1 }
 0x246   :  { %v167_v30 = vadd.f32 %v189_v26, %v159_v27  ;;  %v208_v31 = vpop.f32.mrb[3].mxu1 }
 0x248   :  { %168 = vst.msk [vmem:[#allocation2] sm:$0xff] %vm38_vm0, %v167_v30 }
 0x249   :  { %228 = shalt.err (!%p225_p4)
}
 0x24a   :  { %s229_s4 = scalar_lea.hbm %s314_s5, 128 }
 0x24b   :  { %p230_p5 = scmp.ne.s32.totalorder %s314_s5, %s229_s4  ;;  %p233_p6 = scmp.lt.u32.totalorder %s229_s4, %s314_s5 }
 0x24d   :  { %p235_p7 = pnand %p233_p6, %p230_p5 }
 0x24f   :  { %238 = shalt.err (!%p235_p7)
}
 0x250   :  { %178 = dma.vmem_to_hbm [thread:$0]  %s176_s27, 128, %s314_s5, [#allocation3]  }
 0x251   :  { %239 = dma.done.wait [#allocation3], 128  }
 0x252   :  { %240 = vsyncadd [#allocation3], 4294967168 }
 0x253   :  { %182 = vsyncpa [#allocation3], 1 }

// kernel: tpu_custom_call.1
= control target key start
LH: loop header
LB: loop body
LE: loop exit
PB: predicated region body
PF: predicated region fallthrough
CT: control target
= control target key end

     0   :  { %v241_v1 = vmov 0.0   ;;  %vm38_vm0 = vcmask 130048   ;;  %vm242_vm1 = vmmov 0   ;;  %s309_s0 = inlined_call_operand.vmem [shape: bf16[8,16], index: 0, kind: input, shape index: {}]   ;;  %s310_s1 = inlined_call_operand.vmem [shape: bf16[16,32], index: 1, kind: input, shape index: {}]   ;;  %s311_s2 = inlined_call_operand.vmem [shape: f32[1,32], index: 2, kind: input, shape index: {}]   ;;  %s312_s3 = inlined_call_operand.vmem [shape: bf16[32,16], index: 3, kind: input, shape index: {}]   ;;  %s313_s4 = inlined_call_operand.vmem [shape: f32[1,16], index: 4, kind: input, shape index: {}]   ;;  %s314_s5 = inlined_call_operand.hbm [shape: f32[8,16], index: 5, kind: output, shape index: {}]  }
   0x1   :  { %v212_v0 = vld [vmem:[%s310_s1] sm:$0xff]   ;;  %195 = vmatprep.subr.bf16.mxu0 %v241_v1  ;;  %201 = vmatprep.subr.bf16.mxu1 %v241_v1 }
   0x2   :  { %v22_v2 = vld [vmem:[%s309_s0] sm:$0xf]  ;;  %196 = vmatpush3.bf16.msra.mxu0 %v212_v0  ;;  %197 = vmatprep.mubr.msk.bf16.mxu0 %vm242_vm1, %v241_v1 }
   0x3   :  { %205 = vmatprep.mubr.msk.bf16.mxu1 %vm242_vm1, %v241_v1 }
   0x4   :  { %10 = vsyncpa [#allocation3], 0  ;;  %v213_v3 = vld [vmem:[%s312_s3] sm:$0xff]   ;;  %vm82_vm2 = vcmask 261120   ;;  %v214_v13 = vld [vmem:[%s312_s3 + $0x8] sm:$0xff]   ;;  %s243_s3 = smov [#allocation2]  }
   0x5   :  { %198 = vmatmul.mubr.msk.bf16.vlgmr.msra.gmra.mrb[0].mxu0 %vm38_vm0, %v22_v2  ;;  %202 = vmatpush3.bf16.msra.mxu1 %v213_v3  ;;  %v183_v4 = vld [vmem:[%s311_s2] ss:$0 sm:$0xff]  ;;  %s175_s27 = sshll.u32 %s243_s3, 4  ;;  %s176_s27 = int_to_ptr.vmem [resolvable:$true] %s175_s27 }
   0x6   :  { %203 = vmatprep.subr.bf16.mxu1 %v241_v1  ;;  %v189_v26 = vld [vmem:[%s313_s4] ss:$0 sm:$0xff]  ;;  %s217_s28 = scalar_lea.vmem %s176_s27, 128  ;;  %p222_p1 = scmp.lt.s32.totalorder %s176_s27, %s176_s27 }
   0x7   :  { %p218_p0 = scmp.ne.s32.totalorder %s176_s27, %s217_s28  ;;  %p223_p2 = scmp.lt.s32.totalorder %s217_s28, %s217_s28 }
   0x9   :  { %204 = vmatpush3.bf16.msra.mxu1 %v214_v13  ;;  %p224_p3 = por %p223_p2, %p222_p1 }
   0xb   :  { %p225_p4 = pnand %p224_p3, %p218_p0 }
  0xd8   :  { %v76_v5 = vpop.f32.mrb[0].mxu0 }
  0xd9   :  { %v77_v6 = vadd.f32 %v183_v4, %v76_v5  ;;  %v199_v7 = vpop.f32.mrb[1].mxu0 }
  0xda   :  { %v79_v8 = vpop.f32.mrb[2].mxu0 }
  0xdb   :  { %v200_v9 = vpop.f32.mrb[3].mxu0  ;;  %v83_v10 = vsel %vm82_vm2, %v77_v6, 0.0  ;;  %v88_v11 = vmul.f32 %v77_v6, %v77_v6 }
  0xdc   :  { %84 = vadd.xlane.f32.xlu0 %v83_v10 }
  0xdd   :  { %v89_v12 = vsel %vm82_vm2, %v88_v11, 0.0 }
  0xe0   :  { %90 = vadd.xlane.f32.xlu0 %v89_v12 }
 0x169   :  { %v85_v14 = vpop.xlane.xlu0 %84 }
 0x16a   :  { %v87_v15 = vmul.f32 0.03125, %v85_v14 }
 0x16c   :  { %v98_v16 = vsub.f32 %v77_v6, %v87_v15  ;;  %v93_v20 = vmul.f32 %v87_v15, %v87_v15 }
 0x16d   :  { %v91_v18 = vpop.xlane.xlu0 %90 }
 0x16e   :  { %v99_v17 = vpack.c.bf16 %v98_v16, %v98_v16  ;;  %v92_v19 = vmul.f32 0.03125, %v91_v18 }
 0x170   :  { %206 = vmatmul.mubr.msk.bf16.vlgmr.msra.gmra.mrb[0].mxu1 %vm82_vm2, %v99_v17  ;;  %v94_v21 = vsub.f32 %v92_v19, %v93_v20 }
 0x172   :  { %v95_v22 = vmax.f32 %v94_v21, 0.0 }
 0x174   :  { %v96_v23 = vadd.f32 1e-05, %v95_v22 }
 0x176   :  { %215 = vrsqrt.f32 %v96_v23 }
 0x180   :  { %v216_v24 = vpop.eup %215 }
 0x243   :  { %v153_v25 = vpop.f32.mrb[0].mxu1 }
 0x244   :  { %v159_v27 = vmul.f32 %v216_v24, %v153_v25  ;;  %v207_v28 = vpop.f32.mrb[1].mxu1 }
 0x245   :  { %v156_v29 = vpop.f32.mrb[2].mxu1 }
 0x246   :  { %v167_v30 = vadd.f32 %v189_v26, %v159_v27  ;;  %v208_v31 = vpop.f32.mrb[3].mxu1 }
 0x248   :  { %168 = vst.msk [vmem:[#allocation2] sm:$0xff] %vm38_vm0, %v167_v30 }
 0x249   :  { %228 = shalt.err (!%p225_p4)
}
 0x24a   :  { %s229_s4 = scalar_lea.hbm %s314_s5, 128 }
 0x24b   :  { %p230_p5 = scmp.ne.s32.totalorder %s314_s5, %s229_s4  ;;  %p233_p6 = scmp.lt.u32.totalorder %s229_s4, %s314_s5 }
 0x24d   :  { %p235_p7 = pnand %p233_p6, %p230_p5 }
 0x24f   :  { %238 = shalt.err (!%p235_p7)
}
 0x250   :  { %178 = dma.vmem_to_hbm [thread:$0]  %s176_s27, 128, %s314_s5, [#allocation3]  }
 0x251   :  { %239 = dma.done.wait [#allocation3], 128  }
 0x252   :  { %240 = vsyncadd [#allocation3], 4294967168 }
 0x253   :  { %182 = vsyncpa [#allocation3], 1 }

</bundles_post_ra>
